<compile_context>
chip_gen: v7x
topology: tpu7x:2x2x1
jax: 0.10.0
libtpu: 0.0.40
codegen_flags: <defaults>
</compile_context>

<pallas_src>
import functools

import jax
import jax.numpy as jnp
from jax import lax
from jax.experimental import pallas as pl
from jax.experimental.pallas import tpu as pltpu

LANES = 128
SUBLANES = 8
_ALIGN = LANES * SUBLANES  # 1024-element alignment for the (rows, 128) reshape


def _round_up(x, m):
    return -(-x // m) * m


def _crps_kernel(true_ref, gamma_ref, alpha_ref, beta_ref, c_ref, d_ref, out_ref,
                 *, n_knots, tile_r, chunk_r, valid_rows, mask_tail):
    """Reduce one (tile_r, 128) row tile to a lane-dense (8, 128) partial sum."""
    n_chunks = tile_r // chunk_r
    row0 = pl.program_id(0) * tile_r

    def chunk_body(ci, acc):
        c0 = pl.multiple_of(ci * chunk_r, chunk_r)
        a = alpha_ref[pl.ds(c0, chunk_r), :].astype(jnp.float32)   # alpha_tilde
        z = true_ref[pl.ds(c0, chunk_r), :].astype(jnp.float32)    # observation
        g = gamma_ref[pl.ds(c0, chunk_r), :].astype(jnp.float32)   # gamma

        # (2a-1)*z + (1-2a)*g == (2a-1)*(z-g)
        term = (2.0 * a - 1.0) * (z - g)

        # sum_k beta_k * (c_k - relu(a - d_k)^2),  c_k = (1-d_k^3)/3 - d_k + d_k^2
        for k in range(n_knots):
            d_k = d_ref[k]                          # (1, 128) splat over sublanes
            c_k = c_ref[k]                          # (1, 128)
            r = jnp.maximum(a - d_k, 0.0)
            b_k = beta_ref[k, pl.ds(c0, chunk_r), :].astype(jnp.float32)
            term = term + b_k * (c_k - r * r)

        if mask_tail:
            # Zero rows past the real array extent (partial last grid block).
            ridx = row0 + c0 + lax.broadcasted_iota(jnp.int32, (chunk_r, LANES), 0)
            term = jnp.where(ridx < valid_rows, term, 0.0)

        part = jnp.sum(term.reshape(chunk_r // SUBLANES, SUBLANES, LANES), axis=0)
        return acc + part

    acc = lax.fori_loop(0, n_chunks, chunk_body,
                        jnp.zeros((SUBLANES, LANES), jnp.float32))
    out_ref[...] = acc[None, :, :]


def linear_spline_crps(true, gamma, beta, delta, alpha_tilde, *,
                       tile_rows=2048, chunk_rows=64,
                       transfer_dtype=None, beta_knot_major=False):
    """Pallas implementation of LinearSplineCRPS.forward (returns a scalar).

    true: (B,T,D)  gamma: (B,T,D,1)  delta: (K,)  alpha_tilde: (B,T,D,1)
    beta: (B,T,D,K), or (K,B,T,D) if beta_knot_major=True (no transpose copy).
    transfer_dtype: optional HBM streaming dtype (e.g. jnp.bfloat16); compute
                    and accumulation stay float32 inside the kernel.
    """
    B, T, D = true.shape
    K = beta.shape[0] if beta_knot_major else beta.shape[-1]
    N = B * T * D

    # Minimal alignment for the (rows, 128) reshape; ragged grid tails are
    # masked in-kernel so we never pad up to a full tile multiple.
    n_aligned = _round_up(N, _ALIGN)
    pad = n_aligned - N
    r_valid = n_aligned // LANES               # sublane-rows actually in HBM

    def prep_rows(x):
        x = x.reshape(N)
        if transfer_dtype is not None:
            x = x.astype(transfer_dtype)
        if pad:                                 # zero rows contribute exactly 0
            x = jnp.pad(x, (0, pad))
        return x.reshape(r_valid, LANES)

    true_r = prep_rows(true)
    gamma_r = prep_rows(gamma)
    alpha_r = prep_rows(alpha_tilde)

    if beta_knot_major:
        beta_flat = beta.reshape(K, N)          # free reshape, no copy
    else:
        # TODO(synk): have the upstream producer emit knot-major beta (K,B,T,D)
        #             so this (N,K)->(K,N) transpose (a full HBM copy) disappears.
        beta_flat = jnp.swapaxes(beta.reshape(N, K), 0, 1)
    if transfer_dtype is not None:
        beta_flat = beta_flat.astype(transfer_dtype)
    if pad:
        beta_flat = jnp.pad(beta_flat, ((0, 0), (0, pad)))
    beta_r = beta_flat.reshape(K, r_valid, LANES)

    # Hoisted per-knot constants (f32), pre-broadcast along lanes.
    delta_f = delta.astype(jnp.float32)
    c = (1.0 - delta_f ** 3) / 3.0 - delta_f + delta_f ** 2        # (K,)
    c_b = jnp.broadcast_to(c[:, None, None], (K, 1, LANES)).astype(jnp.float32)
    d_b = jnp.broadcast_to(delta_f[:, None, None], (K, 1, LANES)).astype(jnp.float32)

    # ---- tile / grid derivation -------------------------------------------
    tile_r = max(SUBLANES, min(int(tile_rows), r_valid))
    tile_r = _round_up(tile_r, SUBLANES)
    # v7x megacore: prefer >= 2 grid steps whenever there is enough work.
    if -(-r_valid // tile_r) == 1 and r_valid >= 2 * SUBLANES:
        tile_r = _round_up(-(-r_valid // 2), SUBLANES)
    chunk_r = max(SUBLANES, min(int(chunk_rows), tile_r))
    chunk_r = (chunk_r // SUBLANES) * SUBLANES
    tile_r = _round_up(tile_r, chunk_r)
    g_steps = -(-r_valid // tile_r)
    mask_tail = (g_steps * tile_r) > r_valid

    # ---- VMEM budget / cost estimate ----------------------------------------
    row_bytes = jnp.dtype(true_r.dtype).itemsize
    beta_bytes = jnp.dtype(beta_r.dtype).itemsize
    per_step = tile_r * LANES * (3 * row_bytes + K * beta_bytes)   # input blocks
    per_step += 2 * K * LANES * 4 + SUBLANES * LANES * 4           # knots + output
    vmem_limit = int(min(max(2 * per_step + (8 << 20), 32 << 20), 64 << 20))

    flops = int(N * (4 + 6 * K))
    bytes_accessed = int(3 * true_r.size * row_bytes
                         + beta_r.size * beta_bytes
                         + (c_b.size + d_b.size) * 4
                         + g_steps * SUBLANES * LANES * 4)

    row_spec = pl.BlockSpec((tile_r, LANES), lambda i: (i, 0))
    beta_spec = pl.BlockSpec((K, tile_r, LANES), lambda i: (0, i, 0))
    knot_spec = pl.BlockSpec((K, 1, LANES), lambda i: (0, 0, 0))
    out_spec = pl.BlockSpec((1, SUBLANES, LANES), lambda i: (i, 0, 0))

    kernel = functools.partial(_crps_kernel, n_knots=K, tile_r=tile_r,
                               chunk_r=chunk_r, valid_rows=r_valid,
                               mask_tail=mask_tail)

    partials = pl.pallas_call(
        kernel,
        out_shape=jax.ShapeDtypeStruct((g_steps, SUBLANES, LANES), jnp.float32),
        grid_spec=pltpu.PrefetchScalarGridSpec(
            num_scalar_prefetch=0,
            grid=(g_steps,),
            in_specs=[row_spec, row_spec, row_spec, beta_spec, knot_spec, knot_spec],
            out_specs=out_spec,
        ),
        compiler_params=pltpu.CompilerParams(
            dimension_semantics=("parallel",),
            vmem_limit_bytes=vmem_limit,
        ),
        cost_estimate=pl.CostEstimate(flops=flops, transcendentals=0,
                                      bytes_accessed=bytes_accessed),
    )(true_r, gamma_r, alpha_r, beta_r, c_b, d_b)

    # Tiny cross-tile reduction + 1/N scaling: sum_i mean(crps_i) / d_input
    # == (sum over all elements) / N.
    return jnp.sum(partials) / jnp.float32(N)


def linear_spline_crps_ref(true, gamma, beta, delta, alpha_tilde):
    """Pure-JAX transliteration of the PyTorch forward (f32 reference).

    sum_i mean(crps_i) / d_input equals the mean over every (b, t, i) element,
    so the per-feature loop is vectorized here.
    """
    at = alpha_tilde                                               # (B,T,D,1)
    tmp = (2 * at - 1) * true[..., None] + (1 - 2 * at) * gamma    # (B,T,D,1)
    m = jnp.maximum(at, delta)                                     # (B,T,D,K)
    tmp = tmp + (beta * ((1 - delta ** 3) / 3 - delta - m ** 2)).sum(-1, keepdims=True)
    tmp = tmp + (beta * (2 * m * delta)).sum(-1, keepdims=True)
    return tmp.mean()


def _make_inputs(key, B, T, D, K):
    k1, k2, k3, k4, k5 = jax.random.split(key, 5)
    true = jax.random.normal(k1, (B, T, D), dtype=jnp.float32)
    gamma = jax.random.normal(k2, (B, T, D, 1), dtype=jnp.float32)
    beta = jax.nn.softplus(jax.random.normal(k3, (B, T, D, K), dtype=jnp.float32))
    delta = jnp.sort(jax.random.uniform(k4, (K,), dtype=jnp.float32))
    alpha = jax.random.uniform(k5, (B, T, D, 1), dtype=jnp.float32)
    return true, gamma, beta, delta, alpha


if __name__ == "__main__":
    key = jax.random.PRNGKey(0)
    key1, key2 = jax.random.split(key, 2)

    # --- Case 1: module-sized shapes, f32, default (B,T,D,K) beta layout. ---
    B, T, d_input, K = 2, 8, 4, 5
    true, gamma, beta, delta, alpha = _make_inputs(key1, B, T, d_input, K)
    out = jax.block_until_ready(linear_spline_crps(true, gamma, beta, delta, alpha))
    ref = linear_spline_crps_ref(true, gamma, beta, delta, alpha)
    assert jnp.allclose(out, ref, rtol=1e-5, atol=1e-5), (out, ref)

    # --- Case 2: ragged tail + multi-step grid + chunked loop + knot-major beta. ---
    B2, T2, D2, K2 = 2, 10, 128, 4
    true2, gamma2, beta2, delta2, alpha2 = _make_inputs(key2, B2, T2, D2, K2)
    beta2_km = jnp.moveaxis(beta2, -1, 0)          # (K, B, T, D): no transpose copy
    out2 = jax.block_until_ready(
        linear_spline_crps(true2, gamma2, beta2_km, delta2, alpha2,
                           tile_rows=16, chunk_rows=8, beta_knot_major=True))
    ref2 = linear_spline_crps_ref(true2, gamma2, beta2, delta2, alpha2)
    assert jnp.allclose(out2, ref2, rtol=1e-5, atol=1e-5), (out2, ref2)

    # --- Case 3: bf16 HBM streaming (f32 accumulation in-kernel). ---
    out3 = jax.block_until_ready(
        linear_spline_crps(true2, gamma2, beta2, delta2, alpha2,
                           transfer_dtype=jnp.bfloat16))
    def _rb(x):
        return x.astype(jnp.bfloat16).astype(jnp.float32)
    ref3 = linear_spline_crps_ref(_rb(true2), _rb(gamma2), _rb(beta2), delta2, _rb(alpha2))
    assert jnp.allclose(out3, ref3, rtol=2e-3, atol=2e-3), (out3, ref3)

    print("KERNEL_OK")
</pallas_src>

<mosaic_0001>
module attributes {stable_mosaic.version = 11 : i64} {
  func.func @_crps_kernel(%arg0: i32, %arg1: memref<8x128xf32, #tpu.memory_space<vmem>>, %arg2: memref<8x128xf32, #tpu.memory_space<vmem>>, %arg3: memref<8x128xf32, #tpu.memory_space<vmem>>, %arg4: memref<5x8x128xf32, #tpu.memory_space<vmem>>, %arg5: memref<5x1x128xf32, #tpu.memory_space<vmem>>, %arg6: memref<5x1x128xf32, #tpu.memory_space<vmem>>, %arg7: memref<1x8x128xf32, #tpu.memory_space<vmem>>) attributes {dimension_semantics = [#tpu.dimension_semantics<parallel>], iteration_bounds = array<i64: 1>, scalar_prefetch = 0 : i64, scratch_operands = 0 : i64, tpu.core_type = #tpu.core_type<tc>, window_params = [{transform_indices = @transform_0, window_bounds = array<i64: 8, 128>}, {transform_indices = @transform_1, window_bounds = array<i64: 8, 128>}, {transform_indices = @transform_2, window_bounds = array<i64: 8, 128>}, {transform_indices = @transform_3, window_bounds = array<i64: 5, 8, 128>}, {pipeline_mode = #tpu.pipeline_mode<synchronous>, transform_indices = @transform_4, window_bounds = array<i64: 5, 1, 128>}, {pipeline_mode = #tpu.pipeline_mode<synchronous>, transform_indices = @transform_5, window_bounds = array<i64: 5, 1, 128>}, {transform_indices = @transform_6, window_bounds = array<i64: 1, 8, 128>}]} {
    %cst = arith.constant 0.000000e+00 : f32
    %0 = vector.broadcast %cst : f32 to vector<8x128xf32>
    %c0_i32 = arith.constant 0 : i32
    %c8_i32 = arith.constant 8 : i32
    %1 = arith.muli %c0_i32, %c8_i32 : i32
    %2 = tpu.assume_multiple %1, 8 : i32
    %3 = arith.index_cast %2 : i32 to index
    %c0 = arith.constant 0 : index
    %4 = vector.load %arg3[%3, %c0] : memref<8x128xf32, #tpu.memory_space<vmem>>, vector<8x128xf32>
    %5 = arith.index_cast %2 : i32 to index
    %c0_0 = arith.constant 0 : index
    %6 = vector.load %arg1[%5, %c0_0] : memref<8x128xf32, #tpu.memory_space<vmem>>, vector<8x128xf32>
    %7 = arith.index_cast %2 : i32 to index
    %c0_1 = arith.constant 0 : index
    %8 = vector.load %arg2[%7, %c0_1] : memref<8x128xf32, #tpu.memory_space<vmem>>, vector<8x128xf32>
    %cst_2 = arith.constant 2.000000e+00 : f32
    %9 = vector.broadcast %cst_2 : f32 to vector<8x128xf32>
    %10 = arith.mulf %9, %4 : vector<8x128xf32>
    %cst_3 = arith.constant 1.000000e+00 : f32
    %11 = vector.broadcast %cst_3 : f32 to vector<8x128xf32>
    %12 = arith.subf %10, %11 : vector<8x128xf32>
    %13 = arith.subf %6, %8 : vector<8x128xf32>
    %14 = arith.mulf %12, %13 : vector<8x128xf32>
    %c0_4 = arith.constant 0 : index
    %c0_5 = arith.constant 0 : index
    %c0_6 = arith.constant 0 : index
    %15 = vector.load %arg6[%c0_4, %c0_5, %c0_6] : memref<5x1x128xf32, #tpu.memory_space<vmem>>, vector<1x1x128xf32>
    %16 = vector.shape_cast %15 : vector<1x1x128xf32> to vector<1x128xf32>
    %c0_7 = arith.constant 0 : index
    %c0_8 = arith.constant 0 : index
    %c0_9 = arith.constant 0 : index
    %17 = vector.load %arg5[%c0_7, %c0_8, %c0_9] : memref<5x1x128xf32, #tpu.memory_space<vmem>>, vector<1x1x128xf32>
    %18 = vector.shape_cast %17 : vector<1x1x128xf32> to vector<1x128xf32>
    %19 = vector.broadcast %16 : vector<1x128xf32> to vector<8x128xf32>
    %20 = arith.subf %4, %19 : vector<8x128xf32>
    %cst_10 = arith.constant 0.000000e+00 : f32
    %21 = vector.broadcast %cst_10 : f32 to vector<8x128xf32>
    %22 = arith.maximumf %20, %21 : vector<8x128xf32>
    %c0_11 = arith.constant 0 : index
    %23 = arith.index_cast %2 : i32 to index
    %c0_12 = arith.constant 0 : index
    %24 = vector.load %arg4[%c0_11, %23, %c0_12] : memref<5x8x128xf32, #tpu.memory_space<vmem>>, vector<1x8x128xf32>
    %25 = vector.shape_cast %24 : vector<1x8x128xf32> to vector<8x128xf32>
    %26 = arith.mulf %22, %22 : vector<8x128xf32>
    %27 = vector.broadcast %18 : vector<1x128xf32> to vector<8x128xf32>
    %28 = arith.subf %27, %26 : vector<8x128xf32>
    %29 = arith.mulf %25, %28 : vector<8x128xf32>
    %30 = arith.addf %14, %29 : vector<8x128xf32>
    %c1 = arith.constant 1 : index
    %c0_13 = arith.constant 0 : index
    %c0_14 = arith.constant 0 : index
    %31 = vector.load %arg6[%c1, %c0_13, %c0_14] : memref<5x1x128xf32, #tpu.memory_space<vmem>>, vector<1x1x128xf32>
    %32 = vector.shape_cast %31 : vector<1x1x128xf32> to vector<1x128xf32>
    %c1_15 = arith.constant 1 : index
    %c0_16 = arith.constant 0 : index
    %c0_17 = arith.constant 0 : index
    %33 = vector.load %arg5[%c1_15, %c0_16, %c0_17] : memref<5x1x128xf32, #tpu.memory_space<vmem>>, vector<1x1x128xf32>
    %34 = vector.shape_cast %33 : vector<1x1x128xf32> to vector<1x128xf32>
    %35 = vector.broadcast %32 : vector<1x128xf32> to vector<8x128xf32>
    %36 = arith.subf %4, %35 : vector<8x128xf32>
    %cst_18 = arith.constant 0.000000e+00 : f32
    %37 = vector.broadcast %cst_18 : f32 to vector<8x128xf32>
    %38 = arith.maximumf %36, %37 : vector<8x128xf32>
    %c1_19 = arith.constant 1 : index
    %39 = arith.index_cast %2 : i32 to index
    %c0_20 = arith.constant 0 : index
    %40 = vector.load %arg4[%c1_19, %39, %c0_20] : memref<5x8x128xf32, #tpu.memory_space<vmem>>, vector<1x8x128xf32>
    %41 = vector.shape_cast %40 : vector<1x8x128xf32> to vector<8x128xf32>
    %42 = arith.mulf %38, %38 : vector<8x128xf32>
    %43 = vector.broadcast %34 : vector<1x128xf32> to vector<8x128xf32>
    %44 = arith.subf %43, %42 : vector<8x128xf32>
    %45 = arith.mulf %41, %44 : vector<8x128xf32>
    %46 = arith.addf %30, %45 : vector<8x128xf32>
    %c2 = arith.constant 2 : index
    %c0_21 = arith.constant 0 : index
    %c0_22 = arith.constant 0 : index
    %47 = vector.load %arg6[%c2, %c0_21, %c0_22] : memref<5x1x128xf32, #tpu.memory_space<vmem>>, vector<1x1x128xf32>
    %48 = vector.shape_cast %47 : vector<1x1x128xf32> to vector<1x128xf32>
    %c2_23 = arith.constant 2 : index
    %c0_24 = arith.constant 0 : index
    %c0_25 = arith.constant 0 : index
    %49 = vector.load %arg5[%c2_23, %c0_24, %c0_25] : memref<5x1x128xf32, #tpu.memory_space<vmem>>, vector<1x1x128xf32>
    %50 = vector.shape_cast %49 : vector<1x1x128xf32> to vector<1x128xf32>
    %51 = vector.broadcast %48 : vector<1x128xf32> to vector<8x128xf32>
    %52 = arith.subf %4, %51 : vector<8x128xf32>
    %cst_26 = arith.constant 0.000000e+00 : f32
    %53 = vector.broadcast %cst_26 : f32 to vector<8x128xf32>
    %54 = arith.maximumf %52, %53 : vector<8x128xf32>
    %c2_27 = arith.constant 2 : index
    %55 = arith.index_cast %2 : i32 to index
    %c0_28 = arith.constant 0 : index
    %56 = vector.load %arg4[%c2_27, %55, %c0_28] : memref<5x8x128xf32, #tpu.memory_space<vmem>>, vector<1x8x128xf32>
    %57 = vector.shape_cast %56 : vector<1x8x128xf32> to vector<8x128xf32>
    %58 = arith.mulf %54, %54 : vector<8x128xf32>
    %59 = vector.broadcast %50 : vector<1x128xf32> to vector<8x128xf32>
    %60 = arith.subf %59, %58 : vector<8x128xf32>
    %61 = arith.mulf %57, %60 : vector<8x128xf32>
    %62 = arith.addf %46, %61 : vector<8x128xf32>
    %c3 = arith.constant 3 : index
    %c0_29 = arith.constant 0 : index
    %c0_30 = arith.constant 0 : index
    %63 = vector.load %arg6[%c3, %c0_29, %c0_30] : memref<5x1x128xf32, #tpu.memory_space<vmem>>, vector<1x1x128xf32>
    %64 = vector.shape_cast %63 : vector<1x1x128xf32> to vector<1x128xf32>
    %c3_31 = arith.constant 3 : index
    %c0_32 = arith.constant 0 : index
    %c0_33 = arith.constant 0 : index
    %65 = vector.load %arg5[%c3_31, %c0_32, %c0_33] : memref<5x1x128xf32, #tpu.memory_space<vmem>>, vector<1x1x128xf32>
    %66 = vector.shape_cast %65 : vector<1x1x128xf32> to vector<1x128xf32>
    %67 = vector.broadcast %64 : vector<1x128xf32> to vector<8x128xf32>
    %68 = arith.subf %4, %67 : vector<8x128xf32>
    %cst_34 = arith.constant 0.000000e+00 : f32
    %69 = vector.broadcast %cst_34 : f32 to vector<8x128xf32>
    %70 = arith.maximumf %68, %69 : vector<8x128xf32>
    %c3_35 = arith.constant 3 : index
    %71 = arith.index_cast %2 : i32 to index
    %c0_36 = arith.constant 0 : index
    %72 = vector.load %arg4[%c3_35, %71, %c0_36] : memref<5x8x128xf32, #tpu.memory_space<vmem>>, vector<1x8x128xf32>
    %73 = vector.shape_cast %72 : vector<1x8x128xf32> to vector<8x128xf32>
    %74 = arith.mulf %70, %70 : vector<8x128xf32>
    %75 = vector.broadcast %66 : vector<1x128xf32> to vector<8x128xf32>
    %76 = arith.subf %75, %74 : vector<8x128xf32>
    %77 = arith.mulf %73, %76 : vector<8x128xf32>
    %78 = arith.addf %62, %77 : vector<8x128xf32>
    %c4 = arith.constant 4 : index
    %c0_37 = arith.constant 0 : index
    %c0_38 = arith.constant 0 : index
    %79 = vector.load %arg6[%c4, %c0_37, %c0_38] : memref<5x1x128xf32, #tpu.memory_space<vmem>>, vector<1x1x128xf32>
    %80 = vector.shape_cast %79 : vector<1x1x128xf32> to vector<1x128xf32>
    %c4_39 = arith.constant 4 : index
    %c0_40 = arith.constant 0 : index
    %c0_41 = arith.constant 0 : index
    %81 = vector.load %arg5[%c4_39, %c0_40, %c0_41] : memref<5x1x128xf32, #tpu.memory_space<vmem>>, vector<1x1x128xf32>
    %82 = vector.shape_cast %81 : vector<1x1x128xf32> to vector<1x128xf32>
    %83 = vector.broadcast %80 : vector<1x128xf32> to vector<8x128xf32>
    %84 = arith.subf %4, %83 : vector<8x128xf32>
    %cst_42 = arith.constant 0.000000e+00 : f32
    %85 = vector.broadcast %cst_42 : f32 to vector<8x128xf32>
    %86 = arith.maximumf %84, %85 : vector<8x128xf32>
    %c4_43 = arith.constant 4 : index
    %87 = arith.index_cast %2 : i32 to index
    %c0_44 = arith.constant 0 : index
    %88 = vector.load %arg4[%c4_43, %87, %c0_44] : memref<5x8x128xf32, #tpu.memory_space<vmem>>, vector<1x8x128xf32>
    %89 = vector.shape_cast %88 : vector<1x8x128xf32> to vector<8x128xf32>
    %90 = arith.mulf %86, %86 : vector<8x128xf32>
    %91 = vector.broadcast %82 : vector<1x128xf32> to vector<8x128xf32>
    %92 = arith.subf %91, %90 : vector<8x128xf32>
    %93 = arith.mulf %89, %92 : vector<8x128xf32>
    %94 = arith.addf %78, %93 : vector<8x128xf32>
    %95 = vector.shape_cast %94 : vector<8x128xf32> to vector<1x8x128xf32>
    %cst_45 = arith.constant dense<0.000000e+00> : vector<8x128xf32>
    %96 = vector.multi_reduction <add>, %95, %cst_45 [0] : vector<1x8x128xf32> to vector<8x128xf32>
    %97 = arith.addf %0, %96 : vector<8x128xf32>
    %c1_i32 = arith.constant 1 : i32
    %98 = vector.shape_cast %97 : vector<8x128xf32> to vector<1x8x128xf32>
    %c0_46 = arith.constant 0 : index
    %c0_47 = arith.constant 0 : index
    %c0_48 = arith.constant 0 : index
    %99 = vector.load %arg7[%c0_46, %c0_47, %c0_48] : memref<1x8x128xf32, #tpu.memory_space<vmem>>, vector<1x8x128xf32>
    tpu.vector_store %arg7[%c0_46, %c0_47, %c0_48], %98 {strides = array<i32>} : memref<1x8x128xf32, #tpu.memory_space<vmem>>, vector<1x8x128xf32>,
    return
  }
  func.func @transform_0(%arg0: i32) -> (i32, i32) {
    %c0_i32 = arith.constant 0 : i32
    %c0_i32_0 = arith.constant 0 : i32
    return %arg0, %c0_i32 : i32, i32
  }
  func.func @transform_1(%arg0: i32) -> (i32, i32) {
    %c0_i32 = arith.constant 0 : i32
    %c0_i32_0 = arith.constant 0 : i32
    return %arg0, %c0_i32 : i32, i32
  }
  func.func @transform_2(%arg0: i32) -> (i32, i32) {
    %c0_i32 = arith.constant 0 : i32
    %c0_i32_0 = arith.constant 0 : i32
    return %arg0, %c0_i32 : i32, i32
  }
  func.func @transform_3(%arg0: i32) -> (i32, i32, i32) {
    %c0_i32 = arith.constant 0 : i32
    %c0_i32_0 = arith.constant 0 : i32
    %c0_i32_1 = arith.constant 0 : i32
    return %c0_i32, %arg0, %c0_i32_0 : i32, i32, i32
  }
  func.func @transform_4(%arg0: i32) -> (i32, i32, i32) {
    %c0_i32 = arith.constant 0 : i32
    %c0_i32_0 = arith.constant 0 : i32
    %c0_i32_1 = arith.constant 0 : i32
    %c0_i32_2 = arith.constant 0 : i32
    return %c0_i32, %c0_i32_0, %c0_i32_1 : i32, i32, i32
  }
  func.func @transform_5(%arg0: i32) -> (i32, i32, i32) {
    %c0_i32 = arith.constant 0 : i32
    %c0_i32_0 = arith.constant 0 : i32
    %c0_i32_1 = arith.constant 0 : i32
    %c0_i32_2 = arith.constant 0 : i32
    return %c0_i32, %c0_i32_0, %c0_i32_1 : i32, i32, i32
  }
  func.func @transform_6(%arg0: i32) -> (i32, i32, i32) {
    %c0_i32 = arith.constant 0 : i32
    %c0_i32_0 = arith.constant 0 : i32
    %c0_i32_1 = arith.constant 0 : i32
    return %arg0, %c0_i32, %c0_i32_0 : i32, i32, i32
  }
}

</mosaic_0001>

<bundles_post_ra>
// kernel: tpu_custom_call.1
= control target key start
LH: loop header
LB: loop body
LE: loop exit
PB: predicated region body
PF: predicated region fallthrough
CT: control target
= control target key end

     0   :  { %11 = vsyncpa [#allocation3], 0  ;;  %s508_s0 = inlined_call_operand.hbm [shape: f32[8,128], index: 0, kind: input, shape index: {}]   ;;  %s509_s1 = inlined_call_operand.hbm [shape: f32[8,128], index: 1, kind: input, shape index: {}]   ;;  %s510_s2 = inlined_call_operand.hbm [shape: f32[8,128], index: 2, kind: input, shape index: {}]   ;;  %s511_s3 = inlined_call_operand.hbm [shape: f32[5,8,128], index: 3, kind: input, shape index: {}]   ;;  %s512_s4 = inlined_call_operand.vmem [shape: f32[5,1,128], index: 4, kind: input, shape index: {}]   ;;  %s513_s5 = inlined_call_operand.vmem [shape: f32[5,1,128], index: 5, kind: input, shape index: {}]   ;;  %s514_s6 = inlined_call_operand.hbm [shape: f32[1,8,128], index: 6, kind: output, shape index: {}]  }
   0x1   :  { %12 = vsyncpa [#allocation6], 0 }
   0x2   :  { %13 = vsyncpa [#allocation9], 0 }
   0x3   :  { %14 = vsyncpa [#allocation4], 0  ;;  %s369_s21 = smov [#allocation5]   ;;  %s370_s23 = smov [#allocation2]  }
   0x4   :  { %s31_s22 = sshll.u32 %s369_s21, 4  ;;  %s21_s24 = sshll.u32 %s370_s23, 4  ;;  %s32_s22 = int_to_ptr.vmem [resolvable:$true] %s31_s22  ;;  %s22_s24 = int_to_ptr.vmem [resolvable:$true] %s21_s24 }
   0x5   :  { %s251_s27 = scalar_lea.hbm %s509_s1, 128 }
   0x6   :  { %p252_p0 = scmp.ne.s32.totalorder %s509_s1, %s251_s27  ;;  %p255_p1 = scmp.lt.u32.totalorder %s251_s27, %s509_s1 }
   0x8   :  { %p257_p2 = pnand %p255_p1, %p252_p0 }
   0xa   :  { %260 = shalt.err (!%p257_p2)
}
   0xb   :  { %s261_s8 = scalar_lea.vmem %s32_s22, 128  ;;  %p266_p4 = scmp.lt.s32.totalorder %s32_s22, %s32_s22 }
   0xc   :  { %p262_p3 = scmp.ne.s32.totalorder %s32_s22, %s261_s8  ;;  %p267_p5 = scmp.lt.s32.totalorder %s261_s8, %s261_s8 }
   0xe   :  { %p268_p6 = por %p267_p5, %p266_p4 }
  0x10   :  { %p269_p7 = pnand %p268_p6, %p262_p3 }
  0x12   :  { %272 = shalt.err (!%p269_p7)
}
  0x13   :  { %34 = dma.hbm_to_vmem [thread:$0]  %s509_s1, 128, %s32_s22, [#allocation6]  }
  0x14   :  { %s273_s13 = scalar_lea.hbm %s508_s0, 128 }
  0x15   :  { %p274_p8 = scmp.ne.s32.totalorder %s508_s0, %s273_s13  ;;  %p277_p9 = scmp.lt.u32.totalorder %s273_s13, %s508_s0 }
  0x17   :  { %p279_p10 = pnand %p277_p9, %p274_p8 }
  0x19   :  { %282 = shalt.err (!%p279_p10)
}
  0x1a   :  { %s283_s18 = scalar_lea.vmem %s22_s24, 128  ;;  %p288_p12 = scmp.lt.s32.totalorder %s22_s24, %s22_s24 }
  0x1b   :  { %p284_p11 = scmp.ne.s32.totalorder %s22_s24, %s283_s18  ;;  %p289_p13 = scmp.lt.s32.totalorder %s283_s18, %s283_s18 }
  0x1d   :  { %p290_p0 = por %p289_p13, %p288_p12 }
  0x1f   :  { %p291_p1 = pnand %p290_p0, %p284_p11 }
  0x21   :  { %294 = shalt.err (!%p291_p1)
}
  0x22   :  { %24 = dma.hbm_to_vmem [thread:$0]  %s508_s0, 128, %s22_s24, [#allocation3]  }
  0x23   :  { %s371_s20 = smov [#allocation7]   ;;  %s372_s22 = smov [#allocation8]  }
  0x24   :  { %s41_s21 = sshll.u32 %s371_s20, 4  ;;  %s50_s23 = sshll.u32 %s372_s22, 4  ;;  %s42_s21 = int_to_ptr.vmem [resolvable:$true] %s41_s21  ;;  %s435_s23 = int_to_ptr.vmem [resolvable:$true] %s50_s23 }
  0x25   :  { %s295_s27 = scalar_lea.hbm %s510_s2, 128 }
  0x26   :  { %p296_p2 = scmp.ne.s32.totalorder %s510_s2, %s295_s27  ;;  %p299_p3 = scmp.lt.u32.totalorder %s295_s27, %s510_s2 }
  0x28   :  { %p301_p4 = pnand %p299_p3, %p296_p2 }
  0x2a   :  { %304 = shalt.err (!%p301_p4)
}
  0x2b   :  { %s305_s0 = scalar_lea.vmem %s42_s21, 128  ;;  %p310_p6 = scmp.lt.s32.totalorder %s42_s21, %s42_s21 }
  0x2c   :  { %p306_p5 = scmp.ne.s32.totalorder %s42_s21, %s305_s0  ;;  %p311_p7 = scmp.lt.s32.totalorder %s305_s0, %s305_s0 }
  0x2e   :  { %p312_p8 = por %p311_p7, %p310_p6 }
  0x30   :  { %p313_p9 = pnand %p312_p8, %p306_p5 }
  0x32   :  { %316 = shalt.err (!%p313_p9)
}
  0x33   :  { %44 = dma.hbm_to_vmem [thread:$0]  %s510_s2, 128, %s42_s21, [#allocation6]  }
  0x34   :  { %s317_s11 = scalar_lea.hbm %s511_s3, 640 }
  0x35   :  { %p318_p10 = scmp.ne.s32.totalorder %s511_s3, %s317_s11  ;;  %p321_p11 = scmp.lt.u32.totalorder %s317_s11, %s511_s3 }
  0x37   :  { %p323_p12 = pnand %p321_p11, %p318_p10 }
  0x39   :  { %326 = shalt.err (!%p323_p12)
}
  0x3a   :  { %s327_s16 = scalar_lea.vmem %s435_s23, 640  ;;  %p332_p0 = scmp.lt.s32.totalorder %s435_s23, %s435_s23 }
  0x3b   :  { %p328_p13 = scmp.ne.s32.totalorder %s435_s23, %s327_s16  ;;  %p333_p1 = scmp.lt.s32.totalorder %s327_s16, %s327_s16 }
  0x3d   :  { %p334_p2 = por %p333_p1, %p332_p0 }
  0x3f   :  { %p335_p3 = pnand %p334_p2, %p328_p13 }
  0x41   :  { %338 = shalt.err (!%p335_p3)
}
  0x42   :  { %s373_s2 = smov 128   ;;  %s374_s17 = smov 8  }
  0x43   :  { %56 = dma.hbm_to_vmem [thread:$0]  %s511_s3, 640, %s435_s23, [#allocation9], %s373_s2, %s373_s2, %s374_s17  }
  0x44   :  { %361 = dma.done.wait [#allocation3], 128  }
  0x45   :  { %362 = vsyncadd [#allocation3], 4294967168 }
  0x46   :  { %363 = dma.done.wait [#allocation6], 256  }
  0x47   :  { %364 = vsyncadd [#allocation6], 4294967040 }
  0x48   :  { %365 = dma.done.wait [#allocation9], 640  }
  0x49   :  { %366 = vsyncadd [#allocation9], 4294966656  ;;  %v73_v0 = vld [vmem:[#allocation7] sm:$0xff]  ;;  %v74_v1 = vld [vmem:[#allocation2] sm:$0xff]  ;;  %s375_s12 = smov [#allocation10]  }
  0x4a   :  { %v75_v2 = vld [vmem:[#allocation5] sm:$0xff]  ;;  %v76_v3 = vmul.f32 2.0, %v73_v0  ;;  %v226_v4 = vld [vmem:[%s513_s5] ss:$0 sm:$0xff]  ;;  %v230_v6 = vld [vmem:[%s513_s5 + $0x1] ss:$0 sm:$0xff] }
  0x4b   :  { %v88_v5 = vsub.f32 %v73_v0, %v226_v4  ;;  %v111_v7 = vsub.f32 %v73_v0, %v230_v6  ;;  %v234_v8 = vld [vmem:[%s513_s5 + $0x2] ss:$0 sm:$0xff]  ;;  %v78_v10 = vsub.f32 %v74_v1, %v75_v2  ;;  %v238_v13 = vld [vmem:[%s513_s5 + $0x3] ss:$0 sm:$0xff]  ;;  %v227_v14 = vld [vmem:[%s512_s4] ss:$0 sm:$0xff] }
  0x4c   :  { %v225_v9 = vadd.f32 -1.0, %v76_v3  ;;  %v136_v12 = vsub.f32 %v73_v0, %v234_v8  ;;  %v161_v16 = vsub.f32 %v73_v0, %v238_v13  ;;  %v242_v17 = vld [vmem:[%s513_s5 + $0x4] ss:$0 sm:$0xff]  ;;  %v231_v19 = vld [vmem:[%s512_s4 + $0x1] ss:$0 sm:$0xff]  ;;  %v90_v22 = vld [vmem:[#allocation8] sm:$0xff] }
  0x4d   :  { %v89_v11 = vmax.f32 %v88_v5, 0.0  ;;  %v112_v15 = vmax.f32 %v111_v7, 0.0  ;;  %v186_v21 = vsub.f32 %v73_v0, %v242_v17  ;;  %v235_v24 = vld [vmem:[%s512_s4 + $0x2] ss:$0 sm:$0xff]  ;;  %v239_v30 = vld [vmem:[%s512_s4 + $0x3] ss:$0 sm:$0xff] }
  0x4e   :  { %v137_v20 = vmax.f32 %v136_v12, 0.0  ;;  %v162_v25 = vmax.f32 %v161_v16, 0.0  ;;  %v79_v26 = vmul.f32 %v225_v9, %v78_v10  ;;  %v115_v28 = vld [vmem:[#allocation8 + $0x8] sm:$0xff]  ;;  %v140_v33 = vld [vmem:[#allocation8 + $0x10] sm:$0xff]  ;;  %v165_v40 = vld [vmem:[#allocation8 + $0x18] sm:$0xff]  ;;  %s210_s13 = sshll.u32 %s375_s12, 4  ;;  %s211_s13 = int_to_ptr.vmem [resolvable:$true] %s210_s13 }
  0x4f   :  { %v91_v18 = vmul.f32 %v89_v11, %v89_v11  ;;  %v116_v23 = vmul.f32 %v112_v15, %v112_v15  ;;  %v187_v31 = vmax.f32 %v186_v21, 0.0  ;;  %v243_v35 = vld [vmem:[%s512_s4 + $0x4] ss:$0 sm:$0xff]  ;;  %v190_v45 = vld [vmem:[#allocation8 + $0x20] sm:$0xff]  ;;  %s339_s4 = scalar_lea.vmem %s211_s13, 128  ;;  %p344_p5 = scmp.lt.s32.totalorder %s211_s13, %s211_s13 }
  0x50   :  { %v141_v29 = vmul.f32 %v137_v20, %v137_v20  ;;  %v166_v34 = vmul.f32 %v162_v25, %v162_v25  ;;  %p340_p4 = scmp.ne.s32.totalorder %s211_s13, %s339_s4  ;;  %p345_p6 = scmp.lt.s32.totalorder %s339_s4, %s339_s4 }
  0x51   :  { %v98_v27 = vsub.f32 %v227_v14, %v91_v18  ;;  %v123_v32 = vsub.f32 %v231_v19, %v116_v23  ;;  %v191_v38 = vmul.f32 %v187_v31, %v187_v31 }
  0x52   :  { %v148_v37 = vsub.f32 %v235_v24, %v141_v29  ;;  %v173_v41 = vsub.f32 %v239_v30, %v166_v34  ;;  %p346_p7 = por %p345_p6, %p344_p5 }
  0x53   :  { %v99_v36 = vmul.f32 %v98_v27, %v90_v22  ;;  %v124_v39 = vmul.f32 %v123_v32, %v115_v28  ;;  %v198_v44 = vsub.f32 %v243_v35, %v191_v38 }
  0x54   :  { %v149_v43 = vmul.f32 %v148_v37, %v140_v33  ;;  %v174_v47 = vmul.f32 %v173_v41, %v165_v40  ;;  %p347_p8 = pnand %p346_p7, %p340_p4 }
  0x55   :  { %v100_v42 = vadd.f32 %v99_v36, %v79_v26  ;;  %v199_v49 = vmul.f32 %v198_v44, %v190_v45 }
  0x57   :  { %v125_v46 = vadd.f32 %v124_v39, %v100_v42 }
  0x59   :  { %v150_v48 = vadd.f32 %v149_v43, %v125_v46 }
  0x5b   :  { %v175_v50 = vadd.f32 %v174_v47, %v150_v48 }
  0x5d   :  { %v200_v51 = vadd.f32 %v199_v49, %v175_v50 }
  0x5f   :  { %203 = vst [vmem:[#allocation10] sm:$0xff] %v200_v51 }
  0x60   :  { %350 = shalt.err (!%p347_p8)
}
  0x61   :  { %s351_s16 = scalar_lea.hbm %s514_s6, 128 }
  0x62   :  { %p352_p9 = scmp.ne.s32.totalorder %s514_s6, %s351_s16  ;;  %p355_p10 = scmp.lt.u32.totalorder %s351_s16, %s514_s6 }
  0x64   :  { %p357_p11 = pnand %p355_p10, %p352_p9 }
  0x66   :  { %360 = shalt.err (!%p357_p11)
}
  0x67   :  { %213 = dma.vmem_to_hbm [thread:$0]  %s211_s13, 128, %s514_s6, [#allocation4]  }
  0x68   :  { %367 = dma.done.wait [#allocation4], 128  }
  0x69   :  { %368 = vsyncadd [#allocation4], 4294967168 }
  0x6a   :  { %217 = vsyncpa [#allocation3], 1 }
  0x6b   :  { %218 = vsyncpa [#allocation6], 1 }
  0x6c   :  { %219 = vsyncpa [#allocation9], 1 }
  0x6d   :  { %220 = vsyncpa [#allocation4], 1 }

</bundles_post_ra>
